<compile_context>
chip_gen: v7x
topology: tpu7x:2x2x1
jax: 0.10.0
libtpu: 0.0.40
codegen_flags: <defaults>
</compile_context>

<pallas_src>
import functools

import jax
import jax.numpy as jnp
from jax.experimental import pallas as pl
from jax.experimental.pallas import tpu as pltpu


def _pick_vmem_limit(default=32 * 1024 * 1024):
    # Generation-aware scoped-VMEM budget: v5e/v6e have 128 MiB physical VMEM,
    # v7x has 64 MiB.  Fall back to a conservative 32 MiB if the query fails.
    try:
        phys = pltpu.get_tpu_info().vmem_capacity_bytes
        return int(min(96 * 1024 * 1024, max(default, phys // 2)))
    except Exception:
        return default


_VMEM_LIMIT = _pick_vmem_limit()


# ---------------------------------------------------------------------------
# Fused kernel: cv1 (1x1 conv + folded BN + SiLU) -> 3x MaxPool2d(5,1,2)
#               -> concat -> cv2 (1x1 conv + folded BN + SiLU)
# Layout inside the kernel: channel-first, spatial flattened on lanes.
# ---------------------------------------------------------------------------
def _sppf_fused_kernel(x_ref, hpos_ref, wpos_ref, w1_ref, b1_ref, w2_ref,
                       b2_ref, o_ref, *, H, W):
    # x_ref:    (1, C1, H*W) f32    NCHW slab, spatial flattened on lanes
    # hpos_ref: (1, H*W) int32      h coordinate of each flattened position
    # wpos_ref: (1, H*W) int32      w coordinate of each flattened position
    # w1_ref:   (C_, C1)  bf16      cv1 weight, BN scale folded, transposed
    # b1_ref:   (C_, 1)   f32       cv1 folded BN bias
    # w2_ref:   (C2, 4*C_) bf16     cv2 weight, BN scale folded, transposed
    # b2_ref:   (C2, 1)   f32       cv2 folded BN bias
    # o_ref:    (1, C2, H*W) f32
    HW = x_ref.shape[2]

    # --- cv1: pointwise conv + bias + SiLU (bf16 MXU operands, f32 accum) ---
    x_in = x_ref[0].astype(jnp.bfloat16)                         # (C1, HW)
    z1 = jnp.dot(w1_ref[...], x_in, preferred_element_type=jnp.float32)
    z1 = z1 + b1_ref[...]
    x = z1 * jax.nn.sigmoid(z1)                                  # (C_, HW) f32

    h_pos = hpos_ref[...]                                        # (1, HW)
    w_pos = wpos_ref[...]                                        # (1, HW)
    neg = jnp.float32(-jnp.inf)

    def shifted(v, s):
        # v[:, i + s] (wrapped); callers mask the wrapped lanes.
        return pltpu.roll(v, (-s) % HW, axis=1)

    def pool5(v):
        # 5x5/s1/p2 max pool (== nn.MaxPool2d(5,1,2)), separable: 1x5 along w
        # then 5x1 along h, via XLU lane-rolls + border masks (no padded
        # VMEM copies).
        h = v
        for d in (1, 2):
            h = jnp.maximum(h, jnp.where(w_pos + d < W, shifted(v, d), neg))
            h = jnp.maximum(h, jnp.where(w_pos - d >= 0, shifted(v, -d), neg))
        out = h
        for d in (1, 2):
            out = jnp.maximum(out, jnp.where(h_pos + d < H, shifted(h, d * W), neg))
            out = jnp.maximum(out, jnp.where(h_pos - d >= 0, shifted(h, -d * W), neg))
        return out

    y1 = pool5(x)
    y2 = pool5(y1)
    y3 = pool5(y2)

    # --- cv2 on the in-VMEM concat [x, y1, y2, y3]: one K=4*C_ matmul -------
    cat = jnp.concatenate(
        [x.astype(jnp.bfloat16), y1.astype(jnp.bfloat16),
         y2.astype(jnp.bfloat16), y3.astype(jnp.bfloat16)], axis=0)  # (4C_, HW)
    z2 = jnp.dot(w2_ref[...], cat, preferred_element_type=jnp.float32)
    z2 = z2 + b2_ref[...]
    z2 = z2 * jax.nn.sigmoid(z2)                                 # SiLU (f32)
    o_ref[0] = z2.astype(o_ref.dtype)


def sppf_forward(x_nchw, params):
    N, C1, H, W = x_nchw.shape
    HW = H * W
    C_ = params["w1t_bf16"].shape[0]
    C2 = params["w2t_bf16"].shape[0]

    x = x_nchw.reshape(N, C1, HW)                # free reshape, stays NCHW
    hw = jnp.arange(HW, dtype=jnp.int32)
    h_pos = (hw // W).reshape(1, HW)
    w_pos = (hw % W).reshape(1, HW)

    kern = functools.partial(_sppf_fused_kernel, H=H, W=W)
    out = pl.pallas_call(
        kern,
        out_shape=jax.ShapeDtypeStruct((N, C2, HW), jnp.float32),
        grid=(N,),
        in_specs=[
            pl.BlockSpec((1, C1, HW), lambda n: (n, 0, 0)),
            pl.BlockSpec((1, HW), lambda n: (0, 0)),
            pl.BlockSpec((1, HW), lambda n: (0, 0)),
            pl.BlockSpec((C_, C1), lambda n: (0, 0)),
            pl.BlockSpec((C_, 1), lambda n: (0, 0)),
            pl.BlockSpec((C2, 4 * C_), lambda n: (0, 0)),
            pl.BlockSpec((C2, 1), lambda n: (0, 0)),
        ],
        out_specs=pl.BlockSpec((1, C2, HW), lambda n: (n, 0, 0)),
        compiler_params=pltpu.CompilerParams(
            dimension_semantics=("parallel",),
            vmem_limit_bytes=_VMEM_LIMIT),
    )(x, h_pos, w_pos, params["w1t_bf16"], params["b1_col"],
      params["w2t_bf16"], params["b2_col"])
    return out.reshape(N, C2, H, W)              # free reshape -> NCHW


# ---------------------------------------------------------------------------
# SPPF parameters (eval-mode BatchNorm folded into weight scale + bias)
# ---------------------------------------------------------------------------
def make_sppf_params(c1, c2, key):
    c_ = c1 // 2
    k1, k2 = jax.random.split(key, 2)
    eps = 1e-5

    def fold_bn(gamma, beta, mean, var):
        scale = gamma / jnp.sqrt(var + eps)
        return scale, beta - mean * scale

    # cv1: 1x1 conv (c1 -> c_)
    w1 = jax.random.normal(k1, (c1, c_), dtype=jnp.float32) * 0.2
    g1 = 1.0 + 0.01 * jnp.arange(c_, dtype=jnp.float32)
    b1 = 0.05 * jnp.arange(c_, dtype=jnp.float32)
    m1 = 0.02 * jnp.ones((c_,), dtype=jnp.float32)
    v1 = 0.9 * jnp.ones((c_,), dtype=jnp.float32)
    s1, bb1 = fold_bn(g1, b1, m1, v1)
    w1_f32 = w1 * s1[None, :]                    # fold BN scale into weights

    # cv2: 1x1 conv (4*c_ -> c2)
    w2 = jax.random.normal(k2, (4 * c_, c2), dtype=jnp.float32) * 0.2
    g2 = 1.0 + 0.01 * jnp.arange(c2, dtype=jnp.float32)
    b2 = 0.05 * jnp.arange(c2, dtype=jnp.float32)
    m2 = 0.02 * jnp.ones((c2,), dtype=jnp.float32)
    v2 = 0.9 * jnp.ones((c2,), dtype=jnp.float32)
    s2, bb2 = fold_bn(g2, b2, m2, v2)
    w2_f32 = w2 * s2[None, :]

    return dict(
        # f32, (Cin, Cout) orientation for the pure-JAX reference
        w1_f32=w1_f32, b1_vec=bb1, w2_f32=w2_f32, b2_vec=bb2,
        # bf16, transposed (Cout, Cin) + column biases for the Pallas kernel
        w1t_bf16=jnp.asarray(w1_f32.T, jnp.bfloat16),
        w2t_bf16=jnp.asarray(w2_f32.T, jnp.bfloat16),
        b1_col=bb1.reshape(c_, 1),
        b2_col=bb2.reshape(c2, 1),
    )


# ---------------------------------------------------------------------------
# Pure-JAX f32 reference (matches PyTorch SPPF in eval mode)
# ---------------------------------------------------------------------------
def sppf_reference(x_nchw, params):
    x = jnp.transpose(x_nchw, (0, 2, 3, 1)).astype(jnp.float32)

    def cbs(v, w, b):
        z = jnp.einsum("nhwc,cd->nhwd", v, w) + b
        return z * jax.nn.sigmoid(z)

    def mp(v):
        return jax.lax.reduce_window(
            v, -jnp.inf, jax.lax.max, (1, 5, 5, 1), (1, 1, 1, 1),
            [(0, 0), (2, 2), (2, 2), (0, 0)])

    x = cbs(x, params["w1_f32"], params["b1_vec"])
    y1 = mp(x)
    y2 = mp(y1)
    y3 = mp(y2)
    cat = jnp.concatenate([x, y1, y2, y3], axis=-1)
    out = cbs(cat, params["w2_f32"], params["b2_vec"])
    return jnp.transpose(out, (0, 3, 1, 2))


if __name__ == "__main__":
    key = jax.random.PRNGKey(0)
    k_x, k_p = jax.random.split(key)

    # SPPF(c1=4, c2=8, k=5) on an input of shape (N=2, C=4, H=16, W=16)
    c1, c2 = 4, 8
    N, H, W = 2, 16, 16
    x = jax.random.normal(k_x, (N, c1, H, W), dtype=jnp.float32)
    params = make_sppf_params(c1, c2, k_p)

    out = jax.block_until_ready(sppf_forward(x, params))
    assert out.shape == (N, c2, H, W)
    assert bool(jnp.all(jnp.isfinite(out)))

    ref = jax.block_until_ready(sppf_reference(x, params))
    max_err = float(jnp.max(jnp.abs(out - ref)))
    assert max_err < 5e-2, f"max abs err vs f32 reference: {max_err}"

    print("KERNEL_OK")
</pallas_src>

<mosaic_0001>
module attributes {stable_mosaic.version = 11 : i64} {
  func.func @_sppf_fused_kernel(%arg0: i32, %arg1: memref<1x4x256xf32, #tpu.memory_space<vmem>>, %arg2: memref<1x256xi32, #tpu.memory_space<vmem>>, %arg3: memref<1x256xi32, #tpu.memory_space<vmem>>, %arg4: memref<2x4xbf16, #tpu.memory_space<vmem>>, %arg5: memref<2x1xf32, #tpu.memory_space<vmem>>, %arg6: memref<8x8xbf16, #tpu.memory_space<vmem>>, %arg7: memref<8x1xf32, #tpu.memory_space<vmem>>, %arg8: memref<1x8x256xf32, #tpu.memory_space<vmem>>) attributes {dimension_semantics = [#tpu.dimension_semantics<parallel>], iteration_bounds = array<i64: 2>, scalar_prefetch = 0 : i64, scratch_operands = 0 : i64, tpu.core_type = #tpu.core_type<tc>, window_params = [{transform_indices = @transform_0, window_bounds = array<i64: 1, 4, 256>}, {pipeline_mode = #tpu.pipeline_mode<synchronous>, transform_indices = @transform_1, window_bounds = array<i64: 1, 256>}, {pipeline_mode = #tpu.pipeline_mode<synchronous>, transform_indices = @transform_2, window_bounds = array<i64: 1, 256>}, {pipeline_mode = #tpu.pipeline_mode<synchronous>, transform_indices = @transform_3, window_bounds = array<i64: 2, 4>}, {pipeline_mode = #tpu.pipeline_mode<synchronous>, transform_indices = @transform_4, window_bounds = array<i64: 2, 1>}, {pipeline_mode = #tpu.pipeline_mode<synchronous>, transform_indices = @transform_5, window_bounds = array<i64: 8, 8>}, {pipeline_mode = #tpu.pipeline_mode<synchronous>, transform_indices = @transform_6, window_bounds = array<i64: 8, 1>}, {transform_indices = @transform_7, window_bounds = array<i64: 1, 8, 256>}]} {
    %c0 = arith.constant 0 : index
    %c0_0 = arith.constant 0 : index
    %c0_1 = arith.constant 0 : index
    %0 = vector.load %arg1[%c0, %c0_0, %c0_1] : memref<1x4x256xf32, #tpu.memory_space<vmem>>, vector<1x4x256xf32>
    %1 = vector.shape_cast %0 : vector<1x4x256xf32> to vector<4x256xf32>
    %2 = arith.truncf %1 : vector<4x256xf32> to vector<4x256xbf16>
    %c0_2 = arith.constant 0 : index
    %c0_3 = arith.constant 0 : index
    %3 = vector.load %arg4[%c0_2, %c0_3] : memref<2x4xbf16, #tpu.memory_space<vmem>>, vector<2x4xbf16>
    %cst = arith.constant dense<0.000000e+00> : vector<2x256xf32>
    %4 = tpu.matmul %3, %2, %cst {dimension_numbers = #tpu.dot_dimension_numbers<[1], [0], [0], [1], [0, 0, 1, 1], [], []>} : vector<2x4xbf16>, vector<4x256xbf16>, vector<2x256xf32> -> vector<2x256xf32>
    %c0_4 = arith.constant 0 : index
    %c0_5 = arith.constant 0 : index
    %5 = vector.load %arg5[%c0_4, %c0_5] : memref<2x1xf32, #tpu.memory_space<vmem>>, vector<2x1xf32>
    %6 = vector.broadcast %5 : vector<2x1xf32> to vector<2x256xf32>
    %7 = arith.addf %4, %6 : vector<2x256xf32>
    %8 = arith.negf %7 : vector<2x256xf32>
    %9 = math.exp %8 : vector<2x256xf32>
    %cst_6 = arith.constant 1.000000e+00 : f32
    %10 = vector.broadcast %cst_6 : f32 to vector<2x256xf32>
    %11 = arith.addf %10, %9 : vector<2x256xf32>
    %12 = arith.divf %10, %11 : vector<2x256xf32>
    %13 = arith.mulf %7, %12 : vector<2x256xf32>
    %c0_7 = arith.constant 0 : index
    %c0_8 = arith.constant 0 : index
    %14 = vector.load %arg2[%c0_7, %c0_8] : memref<1x256xi32, #tpu.memory_space<vmem>>, vector<1x256xi32>
    %c0_9 = arith.constant 0 : index
    %c0_10 = arith.constant 0 : index
    %15 = vector.load %arg3[%c0_9, %c0_10] : memref<1x256xi32, #tpu.memory_space<vmem>>, vector<1x256xi32>
    %c1_i32 = arith.constant 1 : i32
    %16 = vector.broadcast %c1_i32 : i32 to vector<1x256xi32>
    %17 = arith.addi %15, %16 : vector<1x256xi32>
    %c16_i32 = arith.constant 16 : i32
    %18 = vector.broadcast %c16_i32 : i32 to vector<1x256xi32>
    %19 = arith.cmpi slt, %17, %18 : vector<1x256xi32>
    %c255_i32 = arith.constant 255 : i32
    %20 = tpu.dynamic_rotate %13 by %c255_i32 dim 1 : vector<2x256xf32>, i32 -> vector<2x256xf32>
    %cst_11 = arith.constant 0xFF800000 : f32
    %21 = vector.shape_cast %19 : vector<1x256xi1> to vector<1x256xi1>
    %22 = vector.broadcast %21 : vector<1x256xi1> to vector<2x256xi1>
    %23 = vector.broadcast %cst_11 : f32 to vector<2x256xf32>
    %24 = arith.select %22, %20, %23 : vector<2x256xi1>, vector<2x256xf32>
    %25 = arith.maximumf %13, %24 : vector<2x256xf32>
    %c1_i32_12 = arith.constant 1 : i32
    %26 = vector.broadcast %c1_i32_12 : i32 to vector<1x256xi32>
    %27 = arith.subi %15, %26 : vector<1x256xi32>
    %c0_i32 = arith.constant 0 : i32
    %28 = vector.broadcast %c0_i32 : i32 to vector<1x256xi32>
    %29 = arith.cmpi sge, %27, %28 : vector<1x256xi32>
    %c1_i32_13 = arith.constant 1 : i32
    %30 = tpu.dynamic_rotate %13 by %c1_i32_13 dim 1 : vector<2x256xf32>, i32 -> vector<2x256xf32>
    %cst_14 = arith.constant 0xFF800000 : f32
    %31 = vector.shape_cast %29 : vector<1x256xi1> to vector<1x256xi1>
    %32 = vector.broadcast %31 : vector<1x256xi1> to vector<2x256xi1>
    %33 = vector.broadcast %cst_14 : f32 to vector<2x256xf32>
    %34 = arith.select %32, %30, %33 : vector<2x256xi1>, vector<2x256xf32>
    %35 = arith.maximumf %25, %34 : vector<2x256xf32>
    %c2_i32 = arith.constant 2 : i32
    %36 = vector.broadcast %c2_i32 : i32 to vector<1x256xi32>
    %37 = arith.addi %15, %36 : vector<1x256xi32>
    %c16_i32_15 = arith.constant 16 : i32
    %38 = vector.broadcast %c16_i32_15 : i32 to vector<1x256xi32>
    %39 = arith.cmpi slt, %37, %38 : vector<1x256xi32>
    %c254_i32 = arith.constant 254 : i32
    %40 = tpu.dynamic_rotate %13 by %c254_i32 dim 1 : vector<2x256xf32>, i32 -> vector<2x256xf32>
    %cst_16 = arith.constant 0xFF800000 : f32
    %41 = vector.shape_cast %39 : vector<1x256xi1> to vector<1x256xi1>
    %42 = vector.broadcast %41 : vector<1x256xi1> to vector<2x256xi1>
    %43 = vector.broadcast %cst_16 : f32 to vector<2x256xf32>
    %44 = arith.select %42, %40, %43 : vector<2x256xi1>, vector<2x256xf32>
    %45 = arith.maximumf %35, %44 : vector<2x256xf32>
    %c2_i32_17 = arith.constant 2 : i32
    %46 = vector.broadcast %c2_i32_17 : i32 to vector<1x256xi32>
    %47 = arith.subi %15, %46 : vector<1x256xi32>
    %c0_i32_18 = arith.constant 0 : i32
    %48 = vector.broadcast %c0_i32_18 : i32 to vector<1x256xi32>
    %49 = arith.cmpi sge, %47, %48 : vector<1x256xi32>
    %c2_i32_19 = arith.constant 2 : i32
    %50 = tpu.dynamic_rotate %13 by %c2_i32_19 dim 1 : vector<2x256xf32>, i32 -> vector<2x256xf32>
    %cst_20 = arith.constant 0xFF800000 : f32
    %51 = vector.shape_cast %49 : vector<1x256xi1> to vector<1x256xi1>
    %52 = vector.broadcast %51 : vector<1x256xi1> to vector<2x256xi1>
    %53 = vector.broadcast %cst_20 : f32 to vector<2x256xf32>
    %54 = arith.select %52, %50, %53 : vector<2x256xi1>, vector<2x256xf32>
    %55 = arith.maximumf %45, %54 : vector<2x256xf32>
    %c1_i32_21 = arith.constant 1 : i32
    %56 = vector.broadcast %c1_i32_21 : i32 to vector<1x256xi32>
    %57 = arith.addi %14, %56 : vector<1x256xi32>
    %c16_i32_22 = arith.constant 16 : i32
    %58 = vector.broadcast %c16_i32_22 : i32 to vector<1x256xi32>
    %59 = arith.cmpi slt, %57, %58 : vector<1x256xi32>
    %c240_i32 = arith.constant 240 : i32
    %60 = tpu.dynamic_rotate %55 by %c240_i32 dim 1 : vector<2x256xf32>, i32 -> vector<2x256xf32>
    %cst_23 = arith.constant 0xFF800000 : f32
    %61 = vector.shape_cast %59 : vector<1x256xi1> to vector<1x256xi1>
    %62 = vector.broadcast %61 : vector<1x256xi1> to vector<2x256xi1>
    %63 = vector.broadcast %cst_23 : f32 to vector<2x256xf32>
    %64 = arith.select %62, %60, %63 : vector<2x256xi1>, vector<2x256xf32>
    %65 = arith.maximumf %55, %64 : vector<2x256xf32>
    %c1_i32_24 = arith.constant 1 : i32
    %66 = vector.broadcast %c1_i32_24 : i32 to vector<1x256xi32>
    %67 = arith.subi %14, %66 : vector<1x256xi32>
    %c0_i32_25 = arith.constant 0 : i32
    %68 = vector.broadcast %c0_i32_25 : i32 to vector<1x256xi32>
    %69 = arith.cmpi sge, %67, %68 : vector<1x256xi32>
    %c16_i32_26 = arith.constant 16 : i32
    %70 = tpu.dynamic_rotate %55 by %c16_i32_26 dim 1 : vector<2x256xf32>, i32 -> vector<2x256xf32>
    %cst_27 = arith.constant 0xFF800000 : f32
    %71 = vector.shape_cast %69 : vector<1x256xi1> to vector<1x256xi1>
    %72 = vector.broadcast %71 : vector<1x256xi1> to vector<2x256xi1>
    %73 = vector.broadcast %cst_27 : f32 to vector<2x256xf32>
    %74 = arith.select %72, %70, %73 : vector<2x256xi1>, vector<2x256xf32>
    %75 = arith.maximumf %65, %74 : vector<2x256xf32>
    %c2_i32_28 = arith.constant 2 : i32
    %76 = vector.broadcast %c2_i32_28 : i32 to vector<1x256xi32>
    %77 = arith.addi %14, %76 : vector<1x256xi32>
    %c16_i32_29 = arith.constant 16 : i32
    %78 = vector.broadcast %c16_i32_29 : i32 to vector<1x256xi32>
    %79 = arith.cmpi slt, %77, %78 : vector<1x256xi32>
    %c224_i32 = arith.constant 224 : i32
    %80 = tpu.dynamic_rotate %55 by %c224_i32 dim 1 : vector<2x256xf32>, i32 -> vector<2x256xf32>
    %cst_30 = arith.constant 0xFF800000 : f32
    %81 = vector.shape_cast %79 : vector<1x256xi1> to vector<1x256xi1>
    %82 = vector.broadcast %81 : vector<1x256xi1> to vector<2x256xi1>
    %83 = vector.broadcast %cst_30 : f32 to vector<2x256xf32>
    %84 = arith.select %82, %80, %83 : vector<2x256xi1>, vector<2x256xf32>
    %85 = arith.maximumf %75, %84 : vector<2x256xf32>
    %c2_i32_31 = arith.constant 2 : i32
    %86 = vector.broadcast %c2_i32_31 : i32 to vector<1x256xi32>
    %87 = arith.subi %14, %86 : vector<1x256xi32>
    %c0_i32_32 = arith.constant 0 : i32
    %88 = vector.broadcast %c0_i32_32 : i32 to vector<1x256xi32>
    %89 = arith.cmpi sge, %87, %88 : vector<1x256xi32>
    %c32_i32 = arith.constant 32 : i32
    %90 = tpu.dynamic_rotate %55 by %c32_i32 dim 1 : vector<2x256xf32>, i32 -> vector<2x256xf32>
    %cst_33 = arith.constant 0xFF800000 : f32
    %91 = vector.shape_cast %89 : vector<1x256xi1> to vector<1x256xi1>
    %92 = vector.broadcast %91 : vector<1x256xi1> to vector<2x256xi1>
    %93 = vector.broadcast %cst_33 : f32 to vector<2x256xf32>
    %94 = arith.select %92, %90, %93 : vector<2x256xi1>, vector<2x256xf32>
    %95 = arith.maximumf %85, %94 : vector<2x256xf32>
    %c1_i32_34 = arith.constant 1 : i32
    %96 = vector.broadcast %c1_i32_34 : i32 to vector<1x256xi32>
    %97 = arith.addi %15, %96 : vector<1x256xi32>
    %c16_i32_35 = arith.constant 16 : i32
    %98 = vector.broadcast %c16_i32_35 : i32 to vector<1x256xi32>
    %99 = arith.cmpi slt, %97, %98 : vector<1x256xi32>
    %c255_i32_36 = arith.constant 255 : i32
    %100 = tpu.dynamic_rotate %95 by %c255_i32_36 dim 1 : vector<2x256xf32>, i32 -> vector<2x256xf32>
    %cst_37 = arith.constant 0xFF800000 : f32
    %101 = vector.shape_cast %99 : vector<1x256xi1> to vector<1x256xi1>
    %102 = vector.broadcast %101 : vector<1x256xi1> to vector<2x256xi1>
    %103 = vector.broadcast %cst_37 : f32 to vector<2x256xf32>
    %104 = arith.select %102, %100, %103 : vector<2x256xi1>, vector<2x256xf32>
    %105 = arith.maximumf %95, %104 : vector<2x256xf32>
    %c1_i32_38 = arith.constant 1 : i32
    %106 = vector.broadcast %c1_i32_38 : i32 to vector<1x256xi32>
    %107 = arith.subi %15, %106 : vector<1x256xi32>
    %c0_i32_39 = arith.constant 0 : i32
    %108 = vector.broadcast %c0_i32_39 : i32 to vector<1x256xi32>
    %109 = arith.cmpi sge, %107, %108 : vector<1x256xi32>
    %c1_i32_40 = arith.constant 1 : i32
    %110 = tpu.dynamic_rotate %95 by %c1_i32_40 dim 1 : vector<2x256xf32>, i32 -> vector<2x256xf32>
    %cst_41 = arith.constant 0xFF800000 : f32
    %111 = vector.shape_cast %109 : vector<1x256xi1> to vector<1x256xi1>
    %112 = vector.broadcast %111 : vector<1x256xi1> to vector<2x256xi1>
    %113 = vector.broadcast %cst_41 : f32 to vector<2x256xf32>
    %114 = arith.select %112, %110, %113 : vector<2x256xi1>, vector<2x256xf32>
    %115 = arith.maximumf %105, %114 : vector<2x256xf32>
    %c2_i32_42 = arith.constant 2 : i32
    %116 = vector.broadcast %c2_i32_42 : i32 to vector<1x256xi32>
    %117 = arith.addi %15, %116 : vector<1x256xi32>
    %c16_i32_43 = arith.constant 16 : i32
    %118 = vector.broadcast %c16_i32_43 : i32 to vector<1x256xi32>
    %119 = arith.cmpi slt, %117, %118 : vector<1x256xi32>
    %c254_i32_44 = arith.constant 254 : i32
    %120 = tpu.dynamic_rotate %95 by %c254_i32_44 dim 1 : vector<2x256xf32>, i32 -> vector<2x256xf32>
    %cst_45 = arith.constant 0xFF800000 : f32
    %121 = vector.shape_cast %119 : vector<1x256xi1> to vector<1x256xi1>
    %122 = vector.broadcast %121 : vector<1x256xi1> to vector<2x256xi1>
    %123 = vector.broadcast %cst_45 : f32 to vector<2x256xf32>
    %124 = arith.select %122, %120, %123 : vector<2x256xi1>, vector<2x256xf32>
    %125 = arith.maximumf %115, %124 : vector<2x256xf32>
    %c2_i32_46 = arith.constant 2 : i32
    %126 = vector.broadcast %c2_i32_46 : i32 to vector<1x256xi32>
    %127 = arith.subi %15, %126 : vector<1x256xi32>
    %c0_i32_47 = arith.constant 0 : i32
    %128 = vector.broadcast %c0_i32_47 : i32 to vector<1x256xi32>
    %129 = arith.cmpi sge, %127, %128 : vector<1x256xi32>
    %c2_i32_48 = arith.constant 2 : i32
    %130 = tpu.dynamic_rotate %95 by %c2_i32_48 dim 1 : vector<2x256xf32>, i32 -> vector<2x256xf32>
    %cst_49 = arith.constant 0xFF800000 : f32
    %131 = vector.shape_cast %129 : vector<1x256xi1> to vector<1x256xi1>
    %132 = vector.broadcast %131 : vector<1x256xi1> to vector<2x256xi1>
    %133 = vector.broadcast %cst_49 : f32 to vector<2x256xf32>
    %134 = arith.select %132, %130, %133 : vector<2x256xi1>, vector<2x256xf32>
    %135 = arith.maximumf %125, %134 : vector<2x256xf32>
    %c1_i32_50 = arith.constant 1 : i32
    %136 = vector.broadcast %c1_i32_50 : i32 to vector<1x256xi32>
    %137 = arith.addi %14, %136 : vector<1x256xi32>
    %c16_i32_51 = arith.constant 16 : i32
    %138 = vector.broadcast %c16_i32_51 : i32 to vector<1x256xi32>
    %139 = arith.cmpi slt, %137, %138 : vector<1x256xi32>
    %c240_i32_52 = arith.constant 240 : i32
    %140 = tpu.dynamic_rotate %135 by %c240_i32_52 dim 1 : vector<2x256xf32>, i32 -> vector<2x256xf32>
    %cst_53 = arith.constant 0xFF800000 : f32
    %141 = vector.shape_cast %139 : vector<1x256xi1> to vector<1x256xi1>
    %142 = vector.broadcast %141 : vector<1x256xi1> to vector<2x256xi1>
    %143 = vector.broadcast %cst_53 : f32 to vector<2x256xf32>
    %144 = arith.select %142, %140, %143 : vector<2x256xi1>, vector<2x256xf32>
    %145 = arith.maximumf %135, %144 : vector<2x256xf32>
    %c1_i32_54 = arith.constant 1 : i32
    %146 = vector.broadcast %c1_i32_54 : i32 to vector<1x256xi32>
    %147 = arith.subi %14, %146 : vector<1x256xi32>
    %c0_i32_55 = arith.constant 0 : i32
    %148 = vector.broadcast %c0_i32_55 : i32 to vector<1x256xi32>
    %149 = arith.cmpi sge, %147, %148 : vector<1x256xi32>
    %c16_i32_56 = arith.constant 16 : i32
    %150 = tpu.dynamic_rotate %135 by %c16_i32_56 dim 1 : vector<2x256xf32>, i32 -> vector<2x256xf32>
    %cst_57 = arith.constant 0xFF800000 : f32
    %151 = vector.shape_cast %149 : vector<1x256xi1> to vector<1x256xi1>
    %152 = vector.broadcast %151 : vector<1x256xi1> to vector<2x256xi1>
    %153 = vector.broadcast %cst_57 : f32 to vector<2x256xf32>
    %154 = arith.select %152, %150, %153 : vector<2x256xi1>, vector<2x256xf32>
    %155 = arith.maximumf %145, %154 : vector<2x256xf32>
    %c2_i32_58 = arith.constant 2 : i32
    %156 = vector.broadcast %c2_i32_58 : i32 to vector<1x256xi32>
    %157 = arith.addi %14, %156 : vector<1x256xi32>
    %c16_i32_59 = arith.constant 16 : i32
    %158 = vector.broadcast %c16_i32_59 : i32 to vector<1x256xi32>
    %159 = arith.cmpi slt, %157, %158 : vector<1x256xi32>
    %c224_i32_60 = arith.constant 224 : i32
    %160 = tpu.dynamic_rotate %135 by %c224_i32_60 dim 1 : vector<2x256xf32>, i32 -> vector<2x256xf32>
    %cst_61 = arith.constant 0xFF800000 : f32
    %161 = vector.shape_cast %159 : vector<1x256xi1> to vector<1x256xi1>
    %162 = vector.broadcast %161 : vector<1x256xi1> to vector<2x256xi1>
    %163 = vector.broadcast %cst_61 : f32 to vector<2x256xf32>
    %164 = arith.select %162, %160, %163 : vector<2x256xi1>, vector<2x256xf32>
    %165 = arith.maximumf %155, %164 : vector<2x256xf32>
    %c2_i32_62 = arith.constant 2 : i32
    %166 = vector.broadcast %c2_i32_62 : i32 to vector<1x256xi32>
    %167 = arith.subi %14, %166 : vector<1x256xi32>
    %c0_i32_63 = arith.constant 0 : i32
    %168 = vector.broadcast %c0_i32_63 : i32 to vector<1x256xi32>
    %169 = arith.cmpi sge, %167, %168 : vector<1x256xi32>
    %c32_i32_64 = arith.constant 32 : i32
    %170 = tpu.dynamic_rotate %135 by %c32_i32_64 dim 1 : vector<2x256xf32>, i32 -> vector<2x256xf32>
    %cst_65 = arith.constant 0xFF800000 : f32
    %171 = vector.shape_cast %169 : vector<1x256xi1> to vector<1x256xi1>
    %172 = vector.broadcast %171 : vector<1x256xi1> to vector<2x256xi1>
    %173 = vector.broadcast %cst_65 : f32 to vector<2x256xf32>
    %174 = arith.select %172, %170, %173 : vector<2x256xi1>, vector<2x256xf32>
    %175 = arith.maximumf %165, %174 : vector<2x256xf32>
    %c1_i32_66 = arith.constant 1 : i32
    %176 = vector.broadcast %c1_i32_66 : i32 to vector<1x256xi32>
    %177 = arith.addi %15, %176 : vector<1x256xi32>
    %c16_i32_67 = arith.constant 16 : i32
    %178 = vector.broadcast %c16_i32_67 : i32 to vector<1x256xi32>
    %179 = arith.cmpi slt, %177, %178 : vector<1x256xi32>
    %c255_i32_68 = arith.constant 255 : i32
    %180 = tpu.dynamic_rotate %175 by %c255_i32_68 dim 1 : vector<2x256xf32>, i32 -> vector<2x256xf32>
    %cst_69 = arith.constant 0xFF800000 : f32
    %181 = vector.shape_cast %179 : vector<1x256xi1> to vector<1x256xi1>
    %182 = vector.broadcast %181 : vector<1x256xi1> to vector<2x256xi1>
    %183 = vector.broadcast %cst_69 : f32 to vector<2x256xf32>
    %184 = arith.select %182, %180, %183 : vector<2x256xi1>, vector<2x256xf32>
    %185 = arith.maximumf %175, %184 : vector<2x256xf32>
    %c1_i32_70 = arith.constant 1 : i32
    %186 = vector.broadcast %c1_i32_70 : i32 to vector<1x256xi32>
    %187 = arith.subi %15, %186 : vector<1x256xi32>
    %c0_i32_71 = arith.constant 0 : i32
    %188 = vector.broadcast %c0_i32_71 : i32 to vector<1x256xi32>
    %189 = arith.cmpi sge, %187, %188 : vector<1x256xi32>
    %c1_i32_72 = arith.constant 1 : i32
    %190 = tpu.dynamic_rotate %175 by %c1_i32_72 dim 1 : vector<2x256xf32>, i32 -> vector<2x256xf32>
    %cst_73 = arith.constant 0xFF800000 : f32
    %191 = vector.shape_cast %189 : vector<1x256xi1> to vector<1x256xi1>
    %192 = vector.broadcast %191 : vector<1x256xi1> to vector<2x256xi1>
    %193 = vector.broadcast %cst_73 : f32 to vector<2x256xf32>
    %194 = arith.select %192, %190, %193 : vector<2x256xi1>, vector<2x256xf32>
    %195 = arith.maximumf %185, %194 : vector<2x256xf32>
    %c2_i32_74 = arith.constant 2 : i32
    %196 = vector.broadcast %c2_i32_74 : i32 to vector<1x256xi32>
    %197 = arith.addi %15, %196 : vector<1x256xi32>
    %c16_i32_75 = arith.constant 16 : i32
    %198 = vector.broadcast %c16_i32_75 : i32 to vector<1x256xi32>
    %199 = arith.cmpi slt, %197, %198 : vector<1x256xi32>
    %c254_i32_76 = arith.constant 254 : i32
    %200 = tpu.dynamic_rotate %175 by %c254_i32_76 dim 1 : vector<2x256xf32>, i32 -> vector<2x256xf32>
    %cst_77 = arith.constant 0xFF800000 : f32
    %201 = vector.shape_cast %199 : vector<1x256xi1> to vector<1x256xi1>
    %202 = vector.broadcast %201 : vector<1x256xi1> to vector<2x256xi1>
    %203 = vector.broadcast %cst_77 : f32 to vector<2x256xf32>
    %204 = arith.select %202, %200, %203 : vector<2x256xi1>, vector<2x256xf32>
    %205 = arith.maximumf %195, %204 : vector<2x256xf32>
    %c2_i32_78 = arith.constant 2 : i32
    %206 = vector.broadcast %c2_i32_78 : i32 to vector<1x256xi32>
    %207 = arith.subi %15, %206 : vector<1x256xi32>
    %c0_i32_79 = arith.constant 0 : i32
    %208 = vector.broadcast %c0_i32_79 : i32 to vector<1x256xi32>
    %209 = arith.cmpi sge, %207, %208 : vector<1x256xi32>
    %c2_i32_80 = arith.constant 2 : i32
    %210 = tpu.dynamic_rotate %175 by %c2_i32_80 dim 1 : vector<2x256xf32>, i32 -> vector<2x256xf32>
    %cst_81 = arith.constant 0xFF800000 : f32
    %211 = vector.shape_cast %209 : vector<1x256xi1> to vector<1x256xi1>
    %212 = vector.broadcast %211 : vector<1x256xi1> to vector<2x256xi1>
    %213 = vector.broadcast %cst_81 : f32 to vector<2x256xf32>
    %214 = arith.select %212, %210, %213 : vector<2x256xi1>, vector<2x256xf32>
    %215 = arith.maximumf %205, %214 : vector<2x256xf32>
    %c1_i32_82 = arith.constant 1 : i32
    %216 = vector.broadcast %c1_i32_82 : i32 to vector<1x256xi32>
    %217 = arith.addi %14, %216 : vector<1x256xi32>
    %c16_i32_83 = arith.constant 16 : i32
    %218 = vector.broadcast %c16_i32_83 : i32 to vector<1x256xi32>
    %219 = arith.cmpi slt, %217, %218 : vector<1x256xi32>
    %c240_i32_84 = arith.constant 240 : i32
    %220 = tpu.dynamic_rotate %215 by %c240_i32_84 dim 1 : vector<2x256xf32>, i32 -> vector<2x256xf32>
    %cst_85 = arith.constant 0xFF800000 : f32
    %221 = vector.shape_cast %219 : vector<1x256xi1> to vector<1x256xi1>
    %222 = vector.broadcast %221 : vector<1x256xi1> to vector<2x256xi1>
    %223 = vector.broadcast %cst_85 : f32 to vector<2x256xf32>
    %224 = arith.select %222, %220, %223 : vector<2x256xi1>, vector<2x256xf32>
    %225 = arith.maximumf %215, %224 : vector<2x256xf32>
    %c1_i32_86 = arith.constant 1 : i32
    %226 = vector.broadcast %c1_i32_86 : i32 to vector<1x256xi32>
    %227 = arith.subi %14, %226 : vector<1x256xi32>
    %c0_i32_87 = arith.constant 0 : i32
    %228 = vector.broadcast %c0_i32_87 : i32 to vector<1x256xi32>
    %229 = arith.cmpi sge, %227, %228 : vector<1x256xi32>
    %c16_i32_88 = arith.constant 16 : i32
    %230 = tpu.dynamic_rotate %215 by %c16_i32_88 dim 1 : vector<2x256xf32>, i32 -> vector<2x256xf32>
    %cst_89 = arith.constant 0xFF800000 : f32
    %231 = vector.shape_cast %229 : vector<1x256xi1> to vector<1x256xi1>
    %232 = vector.broadcast %231 : vector<1x256xi1> to vector<2x256xi1>
    %233 = vector.broadcast %cst_89 : f32 to vector<2x256xf32>
    %234 = arith.select %232, %230, %233 : vector<2x256xi1>, vector<2x256xf32>
    %235 = arith.maximumf %225, %234 : vector<2x256xf32>
    %c2_i32_90 = arith.constant 2 : i32
    %236 = vector.broadcast %c2_i32_90 : i32 to vector<1x256xi32>
    %237 = arith.addi %14, %236 : vector<1x256xi32>
    %c16_i32_91 = arith.constant 16 : i32
    %238 = vector.broadcast %c16_i32_91 : i32 to vector<1x256xi32>
    %239 = arith.cmpi slt, %237, %238 : vector<1x256xi32>
    %c224_i32_92 = arith.constant 224 : i32
    %240 = tpu.dynamic_rotate %215 by %c224_i32_92 dim 1 : vector<2x256xf32>, i32 -> vector<2x256xf32>
    %cst_93 = arith.constant 0xFF800000 : f32
    %241 = vector.shape_cast %239 : vector<1x256xi1> to vector<1x256xi1>
    %242 = vector.broadcast %241 : vector<1x256xi1> to vector<2x256xi1>
    %243 = vector.broadcast %cst_93 : f32 to vector<2x256xf32>
    %244 = arith.select %242, %240, %243 : vector<2x256xi1>, vector<2x256xf32>
    %245 = arith.maximumf %235, %244 : vector<2x256xf32>
    %c2_i32_94 = arith.constant 2 : i32
    %246 = vector.broadcast %c2_i32_94 : i32 to vector<1x256xi32>
    %247 = arith.subi %14, %246 : vector<1x256xi32>
    %c0_i32_95 = arith.constant 0 : i32
    %248 = vector.broadcast %c0_i32_95 : i32 to vector<1x256xi32>
    %249 = arith.cmpi sge, %247, %248 : vector<1x256xi32>
    %c32_i32_96 = arith.constant 32 : i32
    %250 = tpu.dynamic_rotate %215 by %c32_i32_96 dim 1 : vector<2x256xf32>, i32 -> vector<2x256xf32>
    %cst_97 = arith.constant 0xFF800000 : f32
    %251 = vector.shape_cast %249 : vector<1x256xi1> to vector<1x256xi1>
    %252 = vector.broadcast %251 : vector<1x256xi1> to vector<2x256xi1>
    %253 = vector.broadcast %cst_97 : f32 to vector<2x256xf32>
    %254 = arith.select %252, %250, %253 : vector<2x256xi1>, vector<2x256xf32>
    %255 = arith.maximumf %245, %254 : vector<2x256xf32>
    %256 = arith.truncf %13 : vector<2x256xf32> to vector<2x256xbf16>
    %257 = arith.truncf %95 : vector<2x256xf32> to vector<2x256xbf16>
    %258 = arith.truncf %175 : vector<2x256xf32> to vector<2x256xbf16>
    %259 = arith.truncf %255 : vector<2x256xf32> to vector<2x256xbf16>
    %260 = tpu.concatenate %256, %257, %258, %259 in 0 : vector<2x256xbf16>, vector<2x256xbf16>, vector<2x256xbf16>, vector<2x256xbf16> -> vector<8x256xbf16>
    %c0_98 = arith.constant 0 : index
    %c0_99 = arith.constant 0 : index
    %261 = vector.load %arg6[%c0_98, %c0_99] : memref<8x8xbf16, #tpu.memory_space<vmem>>, vector<8x8xbf16>
    %cst_100 = arith.constant dense<0.000000e+00> : vector<8x256xf32>
    %262 = tpu.matmul %261, %260, %cst_100 {dimension_numbers = #tpu.dot_dimension_numbers<[1], [0], [0], [1], [0, 0, 1, 1], [], []>} : vector<8x8xbf16>, vector<8x256xbf16>, vector<8x256xf32> -> vector<8x256xf32>
    %c0_101 = arith.constant 0 : index
    %c0_102 = arith.constant 0 : index
    %263 = vector.load %arg7[%c0_101, %c0_102] : memref<8x1xf32, #tpu.memory_space<vmem>>, vector<8x1xf32>
    %264 = vector.broadcast %263 : vector<8x1xf32> to vector<8x256xf32>
    %265 = arith.addf %262, %264 : vector<8x256xf32>
    %266 = arith.negf %265 : vector<8x256xf32>
    %267 = math.exp %266 : vector<8x256xf32>
    %cst_103 = arith.constant 1.000000e+00 : f32
    %268 = vector.broadcast %cst_103 : f32 to vector<8x256xf32>
    %269 = arith.addf %268, %267 : vector<8x256xf32>
    %270 = arith.divf %268, %269 : vector<8x256xf32>
    %271 = arith.mulf %265, %270 : vector<8x256xf32>
    %c0_104 = arith.constant 0 : index
    %c0_105 = arith.constant 0 : index
    %c0_106 = arith.constant 0 : index
    %272 = vector.load %arg8[%c0_104, %c0_105, %c0_106] : memref<1x8x256xf32, #tpu.memory_space<vmem>>, vector<1x8x256xf32>
    %273 = vector.shape_cast %272 : vector<1x8x256xf32> to vector<8x256xf32>
    %274 = vector.shape_cast %271 : vector<8x256xf32> to vector<1x8x256xf32>
    tpu.vector_store %arg8[%c0_104, %c0_105, %c0_106], %274 {strides = array<i32>} : memref<1x8x256xf32, #tpu.memory_space<vmem>>, vector<1x8x256xf32>,
    return
  }
  func.func @transform_0(%arg0: i32) -> (i32, i32, i32) {
    %c0_i32 = arith.constant 0 : i32
    %c0_i32_0 = arith.constant 0 : i32
    %c0_i32_1 = arith.constant 0 : i32
    return %arg0, %c0_i32, %c0_i32_0 : i32, i32, i32
  }
  func.func @transform_1(%arg0: i32) -> (i32, i32) {
    %c0_i32 = arith.constant 0 : i32
    %c0_i32_0 = arith.constant 0 : i32
    %c0_i32_1 = arith.constant 0 : i32
    return %c0_i32, %c0_i32_0 : i32, i32
  }
  func.func @transform_2(%arg0: i32) -> (i32, i32) {
    %c0_i32 = arith.constant 0 : i32
    %c0_i32_0 = arith.constant 0 : i32
    %c0_i32_1 = arith.constant 0 : i32
    return %c0_i32, %c0_i32_0 : i32, i32
  }
  func.func @transform_3(%arg0: i32) -> (i32, i32) {
    %c0_i32 = arith.constant 0 : i32
    %c0_i32_0 = arith.constant 0 : i32
    %c0_i32_1 = arith.constant 0 : i32
    return %c0_i32, %c0_i32_0 : i32, i32
  }
  func.func @transform_4(%arg0: i32) -> (i32, i32) {
    %c0_i32 = arith.constant 0 : i32
    %c0_i32_0 = arith.constant 0 : i32
    %c0_i32_1 = arith.constant 0 : i32
    return %c0_i32, %c0_i32_0 : i32, i32
  }
  func.func @transform_5(%arg0: i32) -> (i32, i32) {
    %c0_i32 = arith.constant 0 : i32
    %c0_i32_0 = arith.constant 0 : i32
    %c0_i32_1 = arith.constant 0 : i32
    return %c0_i32, %c0_i32_0 : i32, i32
  }
  func.func @transform_6(%arg0: i32) -> (i32, i32) {
    %c0_i32 = arith.constant 0 : i32
    %c0_i32_0 = arith.constant 0 : i32
    %c0_i32_1 = arith.constant 0 : i32
    return %c0_i32, %c0_i32_0 : i32, i32
  }
  func.func @transform_7(%arg0: i32) -> (i32, i32, i32) {
    %c0_i32 = arith.constant 0 : i32
    %c0_i32_0 = arith.constant 0 : i32
    %c0_i32_1 = arith.constant 0 : i32
    return %arg0, %c0_i32, %c0_i32_0 : i32, i32, i32
  }
}

</mosaic_0001>

<bundles_post_ra>
// kernel: tpu_custom_call.1
= control target key start
LH: loop header
LB: loop body
LE: loop exit
PB: predicated region body
PF: predicated region fallthrough
CT: control target
= control target key end

     0   :  { %12 = vsyncpa [#allocation3], 0  ;;  %s1838_s0 = inlined_call_operand.hbm [shape: f32[2,4,256], index: 0, kind: input, shape index: {}]   ;;  %s1839_s1 = inlined_call_operand.vmem [shape: s32[1,256], index: 1, kind: input, shape index: {}]   ;;  %s1840_s2 = inlined_call_operand.vmem [shape: s32[1,256], index: 2, kind: input, shape index: {}]   ;;  %s1841_s3 = inlined_call_operand.vmem [shape: bf16[2,4], index: 3, kind: input, shape index: {}]   ;;  %s1842_s4 = inlined_call_operand.vmem [shape: f32[2,1], index: 4, kind: input, shape index: {}]   ;;  %s1843_s5 = inlined_call_operand.vmem [shape: bf16[8,8], index: 5, kind: input, shape index: {}]   ;;  %s1844_s6 = inlined_call_operand.vmem [shape: f32[8,1], index: 6, kind: input, shape index: {}]   ;;  %s1845_s7 = inlined_call_operand.hbm [shape: f32[2,8,256], index: 7, kind: output, shape index: {}]  }
   0x1   :  { %14 = vsyncpa [#allocation3 + $0x1], 0 }
   0x2   :  { %15 = vsyncpa [#allocation4], 0 }
   0x3   :  { %17 = vsyncpa [#allocation4 + $0x1], 0  ;;  %s1296_s24 = smov 0   ;;  %s1298_s25 = smov 0  }
   0x4   :  { %s1300_s26 = smov 0   ;;  %s1302_s27 = smov 0  }
   0x5 LB: > { %s1317_s28 = sadd.s32 4294967295, %s1243_s27   ;;  %s925_s29 = sadd.s32 4294967294, %s1243_s27   ;;  %s1243_s27 = sphi %s1302_s27, %s1955_s27   ;;  %s1239_s26 = sphi %s1300_s26, %s1954_s26   ;;  %s1235_s25 = sphi %s1298_s25, %s1953_s25   ;;  %s1231_s24 = sphi %s1296_s24, %s1952_s24  }
   0x6   : > { %s1321_s30 = sadd.s32 1, %s1243_s27   ;;  %s30_s8 = sadd.s32 1, %s1239_s26 }
   0x7   : > { %s27_s9 = ssub.s32 %s1243_s27, %s1321_s30  ;;  %p37_p0 = scmp.ne.s32.totalorder %s1239_s26, %s1235_s25 }
   0x8   : > { %p28_p1 = scmp.eq.s32.totalorder %s27_s9, 0  ;;  %p38_p2 = scmp.eq.s32.totalorder %s1243_s27, 0 }
   0x9   : > { %p43_p3 = scmp.ne.s32.totalorder %s1235_s25, %s1231_s24  ;;  %p44_p4 = scmp.eq.s32.totalorder %s1317_s28, 0 }
   0xa   : > { %s1333_s10 = scalar_select %p28_p1, %s1239_s26, %s30_s8  }
   0xb   : > { %p1335_p5 = por %p38_p2, %p37_p0  ;;  %p1339_p6 = por %p44_p4, %p43_p3 }
   0xc   : > { %p193_p7 = scmp.eq.s32.totalorder %s1317_s28, 1  ;;  %p199_p8 = scmp.eq.s32.totalorder %s925_s29, 1 }
   0xd   : > { %p965_p10 = scmp.lt.s32.totalorder %s1243_s27, 2  ;;  %s237_s15 = sand.u32 1, %s1239_s26  }
   0xe   : > { %p1346_p11 = por %p193_p7, %p37_p0  ;;  %p1350_p12 = por %p199_p8, %p43_p3 }
   0xf   : > { %s951_s16 = sshll.u32 %s1243_s27, 7  ;;  %s928_s17 = sshll.u32 %s237_s15, 3 }
  0x10   : > { %s1866_s13 = scalar_select %p1346_p11, 1, 0 }
  0x11   : > { %s1867_s14 = scalar_select %p1350_p12, 1, 0 }
  0x12   : > { %s1359_s20 = scalar_lea.hbm %s1838_s0, %s951_s16  ;;  %s241_s21 = scalar_lea.vmem [#allocation2], %s928_s17 }
  0x13   : > { %s249_s22 = sshll.u32 %s241_s21, 4  ;;  %p1363_p13 = pnand %p965_p10, %p1335_p5  ;;  %s1367_s22 = int_to_ptr.vmem [resolvable:$true] %s249_s22 }
  0x14   : > { %s238_s29 = scalar_lea.sflag [#allocation3], %s237_s15  ;;  %s1147_s8 = scalar_lea.hbm %s1359_s20, 128 }
  0x15   : > { %p1148_p2 = scmp.ne.s32.totalorder %s1359_s20, %s1147_s8  ;;  %p1149_p3 = pneg %p1363_p13 }
  0x16   : > { %s1152_s16 = scalar_lea.hbm %s1838_s0, 256  ;;  %p1153_p5 = scmp.lt.u32.totalorder %s1359_s20, %s1838_s0 }
  0x17   : > { %p1150_p4 = pnand %p1149_p3, %p1148_p2  ;;  %p1154_p8 = scmp.lt.u32.totalorder %s1152_s16, %s1147_s8 }
  0x18   : > { %p1156_p9 = scmp.lt.u32.totalorder %s1147_s8, %s1359_s20 }
  0x19   : > { %p1151_p7 = pneg %p1150_p4  ;;  %p1155_p10 = por %p1154_p8, %p1153_p5 }
  0x1b   : > { %p1157_p0 = por %p1156_p9, %p1155_p10 }
  0x1d   : > { %p1158_p1 = pnand %p1157_p0, %p1151_p7 }
  0x1f   : > { %1161 = shalt.err (!%p1158_p1)
}
  0x20   : > { %s1162_s15 = scalar_lea.vmem %s1367_s22, 128  ;;  %s1245_s19 = smov [#allocation2]  }
  0x21   : > { %p1163_p2 = scmp.ne.s32.totalorder %s1367_s22, %s1162_s15  ;;  %s1167_s21 = sshll.u32 %s1245_s19, 4  ;;  %s1168_s21 = int_to_ptr.vmem [resolvable:$false] %s1167_s21 }
  0x22   : > { %s1169_s9 = scalar_lea.vmem %s1168_s21, 256  ;;  %p1170_p11 = scmp.lt.s32.totalorder %s1367_s22, %s1168_s21 }
  0x23   : > { %p1165_p4 = pnand %p1163_p2, %p1149_p3  ;;  %p1171_p5 = scmp.lt.s32.totalorder %s1169_s9, %s1162_s15 }
  0x25   : > { %p1166_p12 = pneg %p1165_p4  ;;  %p1172_p8 = por %p1171_p5, %p1170_p11 }
  0x27   : > { %p1173_p9 = pnand %p1172_p8, %p1166_p12 }
  0x29   : > { %1176 = shalt.err (!%p1173_p9)
}
  0x2a   : > { %960 = dma.hbm_to_vmem [thread:$0]  (!%p1363_p13), %s1359_s20, 128, %s1367_s22, %s238_s29  }
  0x2b   : > { %p1869_p0 = scmp.lt.s32.totalorder %s1243_s27, 3  ;;  %p1870_p1 = scmp.ge.s32.totalorder %s1243_s27, 1 }
  0x2d   : > { %p255_p3 = pnand %p1870_p1, %p1869_p0 }
  0x2e   : > { %s1401_s8 = sand.u32 (!%p255_p3), 1, %s1235_s25  }
  0x2f   : > { %258 = sbr.rel (%p255_p3) target bundleno = 1358 (0x54e), region = 48  ;;  %s932_s11 = sshll.u32 (!%p255_p3), %s1401_s8, 3 }
  0x30   : > { %s261_s16 = scalar_lea.sflag (!%p255_p3), [#allocation3], %s1401_s8  ;;  %s264_s17 = scalar_lea.vmem (!%p255_p3), [#allocation2], %s932_s11 }
  0x36   : > { %1222 = dma.done.wait (%p1339_p6), %s261_s16, 128  }
  0x37   : > { %1224 = vsyncadd (%p1339_p6), %s261_s16, 4294967168  ;;  %v1246_v0 = vmov 0   ;;  %v296_v1 = vld [vmem:[%s264_s17] sm:$0xff]  ;;  %vm1847_vm0 = vcmask 1041408   ;;  %vm309_vm1 = vcmask 31744   ;;  %s1247_s29 = smov 1   ;;  %v383_v27 = vlaneseq }
  0x38   : > { %352 = vmatprep.mubr.bf16.mxu0 %v1246_v0  ;;  %1008 = vset.pattern.permute.xlu0 %v1246_v0  ;;  %v303_v2 = vld [vmem:[%s1842_s4] sm:$0x3]  ;;  %v298_v3 = vcombine.high %v296_v1, %v296_v1  ;;  %v300_v4 = vpack.c.bf16 %v296_v1, %v296_v1  ;;  %s1248_s18 = smov 127   ;;  %s1249_s15 = smov 126  }
  0x39   : > { %815 = vmatprep.mubr.bf16.mxu1 %v1246_v0  ;;  %1129 = vset.pattern.permute.xlu1 %v1246_v0  ;;  %v302_v7 = vld [vmem:[%s1841_s3] sm:$0x1]  ;;  %s1250_s19 = smov 2   ;;  %v390_v30 = vshrl.u32 %v383_v27, 7  ;;  %v1440_v37 = vand.u32 127, %v383_v27  ;;  %s1251_s11 = smov 16  }
  0x3a   : > { %306 = vperm.xlu0 %1008, %v303_v2   ;;  %v301_v5 = vpack.c.bf16 %v298_v3, %v298_v3  ;;  %v315_v6 = vsel %vm1847_vm0, %v300_v4, 0  ;;  %v376_v26 = vld [vmem:[%s1840_s2] sm:$0x3]  ;;  %v1883_v4 = vmov 0  ;;  %s1252_s16 = smov 112   ;;  %s1253_s17 = smov 32  }
  0x3b   : > { %v938_v28 = vadd.s32 4294967295, %v376_v26  ;;  %v377_v29 = vadd.s32 1, %v376_v26  ;;  %v427_v31 = vadd.s32 2, %v376_v26  ;;  %v939_v32 = vadd.s32 4294967294, %v376_v26  ;;  %s1254_s20 = smov 96   ;;  %v768_v58 = vld [vmem:[%s1844_s6] sm:$0xff] }
  0x3c   : > { %934 = vmatprep.subr.msk.bf16.mxu0 %vm1847_vm0, %v301_v5  ;;  %v1434_v33 = vsub.s32 0, %v390_v30  ;;  %v1436_v34 = vsub.s32 1, %v390_v30  ;;  %vm1851_vm6 = vcmp.lt.s32.totalorder %v1440_v37, 1  ;;  %vm1850_vm9 = vcmp.lt.s32.totalorder %v1440_v37, 127  ;;  %s952_s21 = sshll.u32 %s1317_s28, 8  ;;  %s841_s22 = scalar_lea.sflag [#allocation4], %s1401_s8 }
  0x3d   : > { %321 = vmatpush1.bf16.msra.mxu0 %v315_v6  ;;  %vm404_vm2 = vcmp.ge.s32.totalorder %v938_v28, 0  ;;  %vm378_vm3 = vcmp.lt.s32.totalorder %v377_v29, 16  ;;  %vm428_vm4 = vcmp.lt.s32.totalorder %v427_v31, 16  ;;  %vm452_vm5 = vcmp.ge.s32.totalorder %v939_v32, 0  ;;  %v375_v32 = vld [vmem:[%s1839_s1] sm:$0x3] }
  0x3e   : > { %v412_v35 = vsel %vm404_vm2, 1, %v1246_v0  ;;  %v388_v36 = vsel %vm378_vm3, 1, %v1246_v0  ;;  %v436_v40 = vsel %vm428_vm4, 1, %v1246_v0  ;;  %v460_v43 = vsel %vm452_vm5, 1, %v1246_v0  ;;  %p1949_p11 = scmp.ne.s32.totalorder %s1866_s13, 0  ;;  %s1255_s12 = smov [#allocation5]  }
  0x3f   : > { %v416_v38 = vrot.slane %v412_v35, %v1434_v33  ;;  %v420_v39 = vrot.slane %v412_v35, %v1436_v34  ;;  %v392_v41 = vrot.slane %v388_v36, %v1434_v33  ;;  %v396_v42 = vrot.slane %v388_v36, %v1436_v34  ;;  %s1181_s23 = sshll.u32 %s1255_s12, 4  ;;  %s1182_s23 = int_to_ptr.vmem [resolvable:$false] %s1181_s23 }
  0x40   : > { %935 = vmatmul.mubr.msk.bf16.vlgmr.msra.gmra.mrb[0].mxu0 %vm309_vm1, %v302_v7  ;;  %v440_v44 = vrot.slane %v436_v40, %v1434_v33  ;;  %v444_v45 = vrot.slane %v436_v40, %v1436_v34  ;;  %v464_v52 = vrot.slane %v460_v43, %v1434_v33  ;;  %v468_v53 = vrot.slane %v460_v43, %v1436_v34 }
  0x41   : > { %vm1451_vm7 = vcmp.eq.s32.totalorder %v416_v38, 1  ;;  %vm1455_vm8 = vcmp.eq.s32.totalorder %v420_v39, 1  ;;  %vm1460_vm10 = vcmp.eq.s32.totalorder %v392_v41, 1  ;;  %vm1464_vm11 = vcmp.eq.s32.totalorder %v396_v42, 1 }
  0x42   : > { %vm1848_vm12 = vcmp.lt.s32.totalorder %v1440_v37, 126  ;;  %vm1471_vm13 = vcmp.eq.s32.totalorder %v440_v44, 1  ;;  %vm1475_vm14 = vcmp.eq.s32.totalorder %v444_v45, 1  ;;  %vm1849_vm15 = vcmp.lt.s32.totalorder %v1440_v37, 2 }
  0x43   : > { %vm1492_vm1 = vcmp.eq.s32.totalorder %v464_v52, 1  ;;  %vm1496_vm2 = vcmp.eq.s32.totalorder %v468_v53, 1  ;;  %v1885_v5 = vmov 0  ;;  %v940_v35 = vadd.s32 4294967295, %v375_v32 }
  0x44   : > { %v1884_v4 = vsel %vm1492_vm1, 4294967295, %v1883_v4  ;;  %v1886_v5 = vsel %vm1496_vm2, 4294967295, %v1885_v5  ;;  %v475_v36 = vadd.s32 1, %v375_v32  ;;  %v523_v38 = vadd.s32 2, %v375_v32 }
  0x45   : > { %vm500_vm3 = vcmp.ge.s32.totalorder %v940_v35, 0  ;;  %v941_v40 = vadd.s32 4294967294, %v375_v32  ;;  %v1889_v52 = vmov 0 }
  0x46   : > { %vm476_vm4 = vcmp.lt.s32.totalorder %v475_v36, 16  ;;  %v508_v39 = vsel %vm500_vm3, 1, %v1246_v0  ;;  %vm524_vm5 = vcmp.lt.s32.totalorder %v523_v38, 16 }
  0x47   : > { %v484_v41 = vsel %vm476_vm4, 1, %v1246_v0  ;;  %v512_v42 = vrot.slane %v508_v39, %v1434_v33  ;;  %v516_v43 = vrot.slane %v508_v39, %v1436_v34  ;;  %vm548_vm0 = vcmp.ge.s32.totalorder %v941_v40, 0 }
  0x48   : > { %v488_v44 = vrot.slane %v484_v41, %v1434_v33  ;;  %v492_v45 = vrot.slane %v484_v41, %v1436_v34  ;;  %vm1852_vm4 = vcmp.lt.s32.totalorder %v1440_v37, 112  ;;  %v556_v53 = vsel %vm548_vm0, 1, %v1246_v0 }
  0x49   : > { %vm1541_vm3 = vcmp.eq.s32.totalorder %v516_v43, 1 }
  0x4a   : > { %v1890_v52 = vsel %vm1541_vm3, 4294967295, %v1889_v52 }
  0xb9   : > { %v307_v8 = vpop.permute.xlu0 %306 }
 0x113   : > { %v354_v9 = vpop.f32.mrb[0].mxu0 }
 0x114   : > { %v355_v10 = vadd.f32 %v354_v9, %v307_v8  ;;  %v356_v11 = vpop.f32.mrb[1].mxu0 }
 0x115   : > { %v357_v12 = vadd.f32 %v356_v11, %v307_v8  ;;  %v358_v13 = vpop.f32.mrb[2].mxu0 }
 0x116   : > { %v936_v14 = vmul.f32 -1.442695, %v355_v10  ;;  %v359_v15 = vpop.f32.mrb[3].mxu0 }
 0x117   : > { %v937_v16 = vmul.f32 -1.442695, %v357_v12 }
 0x118   : > { %1131 = vpow2.f32 %v936_v14 }
 0x119   : > { %1133 = vpow2.f32 %v937_v16 }
 0x122   : > { %v1132_v17 = vpop.eup %1131 }
 0x123   : > { %v1134_v18 = vpop.eup %1133  ;;  %v367_v19 = vadd.f32 1.0, %v1132_v17 }
 0x124   : > { %v368_v20 = vadd.f32 1.0, %v1134_v18 }
 0x125   : > { %1135 = vrcp.f32 %v367_v19 }
 0x126   : > { %1137 = vrcp.f32 %v368_v20 }
 0x12f   : > { %v1136_v21 = vpop.eup %1135 }
 0x130   : > { %v1138_v22 = vpop.eup %1137  ;;  %v1421_v23 = vmul.f32 %v1136_v21, %v355_v10 }
 0x131   : > { %v1423_v24 = vmul.f32 %v1138_v22, %v357_v12 }
 0x133   : > { %v1014_v25 = vpack.i.bf16 %v1423_v24, %v1421_v23 }
 0x135   : > { %1015 = vrot.lane.b32.xlu1 %v1014_v25, %s1247_s29  ;;  %1010 = vrot.lane.b32.xlu0 %v1014_v25, %s1248_s18 }
 0x139   : > { %1020 = vrot.lane.b32.xlu1 %v1014_v25, %s1249_s15  ;;  %1025 = vrot.lane.b32.xlu0 %v1014_v25, %s1250_s19 }
 0x1a7   : > { %v1016_v48 = vpop.permute.xlu1 %1015  ;;  %v1011_v51 = vpop.permute.xlu0 %1010 }
 0x1a8   : > { %v1018_v54 = vunpack.i.h.bf16 %v1016_v48  ;;  %v1017_v55 = vunpack.i.l.bf16 %v1016_v48  ;;  %v1013_v56 = vunpack.i.h.bf16 %v1011_v51  ;;  %v1012_v57 = vunpack.i.l.bf16 %v1011_v51 }
 0x1a9   : > { %v532_v48 = vsel %vm524_vm5, 1, %v1246_v0  ;;  %v1887_v51 = vmov 0  ;;  %vm1551_vm5 = vcmp.eq.s32.totalorder %v492_v45, 1  ;;  %v560_v0 = vrot.slane %v556_v53, %v1434_v33 }
 0x1aa   : > { %v410_v60 = vsel %vm1851_vm6, %v1017_v55, %v1018_v54  ;;  %v411_v61 = vsel %vm1851_vm6, %v1018_v54, %v1017_v55  ;;  %v386_v62 = vsel %vm1850_vm9, %v1012_v57, %v1013_v56  ;;  %v387_v63 = vsel %vm1850_vm9, %v1013_v56, %v1012_v57 }
 0x1ab   : > { %v399_v1 = vsel %vm1460_vm10, %v386_v62, -inf  ;;  %v400_v2 = vsel %vm1464_vm11, %v387_v63, -inf  ;;  %v1021_v3 = vpop.permute.xlu1 %1020  ;;  %v1026_v6 = vpop.permute.xlu0 %1025  ;;  %v423_v11 = vsel %vm1451_vm7, %v411_v61, -inf  ;;  %v424_v12 = vsel %vm1455_vm8, %v410_v60, -inf }
 0x1ac   : > { %v401_v7 = vmax.f32 %v1421_v23, %v399_v1  ;;  %v402_v8 = vmax.f32 %v1423_v24, %v400_v2  ;;  %v1023_v9 = vunpack.i.h.bf16 %v1021_v3  ;;  %v1022_v10 = vunpack.i.l.bf16 %v1021_v3 }
 0x1ad   : > { %v1028_v13 = vunpack.i.h.bf16 %v1026_v6  ;;  %v1027_v14 = vunpack.i.l.bf16 %v1026_v6  ;;  %vm1547_vm9 = vcmp.eq.s32.totalorder %v488_v44, 1  ;;  %v1891_v55 = vmov 0 }
 0x1ae   : > { %v425_v15 = vmax.f32 %v401_v7, %v423_v11  ;;  %v426_v16 = vmax.f32 %v402_v8, %v424_v12  ;;  %v434_v17 = vsel %vm1848_vm12, %v1022_v10, %v1023_v9  ;;  %v435_v18 = vsel %vm1848_vm12, %v1023_v9, %v1022_v10 }
 0x1af   : > { %v447_v19 = vsel %vm1471_vm13, %v434_v17, -inf  ;;  %v448_v20 = vsel %vm1475_vm14, %v435_v18, -inf  ;;  %v458_v21 = vsel %vm1849_vm15, %v1027_v14, %v1028_v13  ;;  %v459_v22 = vsel %vm1849_vm15, %v1028_v13, %v1027_v14 }
 0x1b0   : > { %v449_v25 = vmax.f32 %v425_v15, %v447_v19  ;;  %v450_v26 = vmax.f32 %v426_v16, %v448_v20  ;;  %v471_v27 = vsel %vm1492_vm1, %v459_v22, -inf  ;;  %v472_v28 = vsel %vm1496_vm2, %v458_v21, -inf }
 0x1b1   : > { %vm1853_vm12 = vcmp.lt.s32.totalorder %v1440_v37, 16  ;;  %vm1537_vm15 = vcmp.eq.s32.totalorder %v512_v42, 1  ;;  %v1892_v55 = vsel %vm1547_vm9, 4294967295, %v1891_v55  ;;  %v1893_v56 = vmov 0 }
 0x1b2   : > { %v473_v29 = vmax.f32 %v449_v25, %v471_v27  ;;  %v474_v30 = vmax.f32 %v450_v26, %v472_v28  ;;  %v1888_v51 = vsel %vm1537_vm15, 4294967295, %v1887_v51  ;;  %v1894_v56 = vsel %vm1551_vm5, 4294967295, %v1893_v56 }
 0x1b3   : > { %v536_v60 = vrot.slane %v532_v48, %v1434_v33  ;;  %v540_v61 = vrot.slane %v532_v48, %v1436_v34  ;;  %v564_v3 = vrot.slane %v556_v53, %v1436_v34 }
 0x1b4   : > { %v1034_v31 = vpack.i.bf16 %v474_v30, %v473_v29 }
 0x1b5   : > { %vm1573_vm6 = vcmp.eq.s32.totalorder %v536_v60, 1  ;;  %vm1577_vm0 = vcmp.eq.s32.totalorder %v540_v61, 1 }
 0x1b6   : > { %1035 = vrot.lane.b32.xlu0 %v1034_v31, %s1251_s11  ;;  %1030 = vrot.lane.b32.xlu1 %v1034_v31, %s1252_s16 }
 0x1ba   : > { %1045 = vrot.lane.b32.xlu0 %v1034_v31, %s1253_s17  ;;  %1040 = vrot.lane.b32.xlu1 %v1034_v31, %s1254_s20 }
 0x228   : > { %v1036_v54 = vpop.permute.xlu0 %1035  ;;  %v1031_v57 = vpop.permute.xlu1 %1030 }
 0x229   : > { %v1038_v62 = vunpack.i.h.bf16 %v1036_v54  ;;  %v1037_v63 = vunpack.i.l.bf16 %v1036_v54  ;;  %v1033_v1 = vunpack.i.h.bf16 %v1031_v57  ;;  %v1032_v2 = vunpack.i.l.bf16 %v1031_v57 }
 0x22b   : > { %v506_v6 = vsel %vm1853_vm12, %v1037_v63, %v1038_v62  ;;  %v507_v7 = vsel %vm1853_vm12, %v1038_v62, %v1037_v63  ;;  %v482_v8 = vsel %vm1852_vm4, %v1032_v2, %v1033_v1  ;;  %v483_v9 = vsel %vm1852_vm4, %v1033_v1, %v1032_v2 }
 0x22c   : > { %v495_v10 = vsel %vm1547_vm9, %v482_v8, -inf  ;;  %v496_v33 = vsel %vm1551_vm5, %v483_v9, -inf  ;;  %v1046_v34 = vpop.permute.xlu0 %1045  ;;  %v1041_v13 = vpop.permute.xlu1 %1040  ;;  %v519_v18 = vsel %vm1537_vm15, %v507_v7, -inf  ;;  %v520_v19 = vsel %vm1541_vm3, %v506_v6, -inf }
 0x22d   : > { %v497_v14 = vmax.f32 %v473_v29, %v495_v10  ;;  %v498_v15 = vmax.f32 %v474_v30, %v496_v33  ;;  %v1048_v16 = vunpack.i.h.bf16 %v1046_v34  ;;  %v1047_v17 = vunpack.i.l.bf16 %v1046_v34 }
 0x22e   : > { %v1043_v20 = vunpack.i.h.bf16 %v1041_v13  ;;  %v1042_v21 = vunpack.i.l.bf16 %v1041_v13  ;;  %vm1585_vm4 = vcmp.eq.s32.totalorder %v560_v0, 1  ;;  %vm1589_vm12 = vcmp.eq.s32.totalorder %v564_v3, 1 }
 0x22f   : > { %v521_v26 = vmax.f32 %v497_v14, %v519_v18  ;;  %v522_v27 = vmax.f32 %v498_v15, %v520_v19  ;;  %vm1903_vm5 = vcmp.lt.s32.totalorder %v1440_v37, 32  ;;  %vm1905_vm3 = vcmp.lt.s32.totalorder %v1440_v37, 96 }
 0x230   : > { %v554_v28 = vsel %vm1903_vm5, %v1047_v17, %v1048_v16  ;;  %vm1904_vm15 = vmmov %vm1903_vm5  ;;  %v530_v30 = vsel %vm1905_vm3, %v1042_v21, %v1043_v20 }
 0x231   : > { %v555_v29 = vsel %vm1904_vm15, %v1048_v16, %v1047_v17  ;;  %vm1906_vm9 = vmmov %vm1905_vm3  ;;  %v543_v32 = vsel %vm1573_vm6, %v530_v30, -inf  ;;  %v568_v40 = vsel %vm1589_vm12, %v554_v28, -inf  ;;  %vm1909_vm3 = vcmp.lt.s32.totalorder %v1440_v37, 127 }
 0x232   : > { %v531_v31 = vsel %vm1906_vm9, %v1043_v20, %v1042_v21  ;;  %v545_v36 = vmax.f32 %v521_v26, %v543_v32  ;;  %v567_v39 = vsel %vm1585_vm4, %v555_v29, -inf  ;;  %vm1907_vm9 = vcmp.lt.s32.totalorder %v1440_v37, 1  ;;  %vm1910_vm5 = vmmov %vm1909_vm3 }
 0x233   : > { %v544_v35 = vsel %vm1577_vm0, %v531_v31, -inf  ;;  %vm1908_vm15 = vmmov %vm1907_vm9 }
 0x234   : > { %v546_v38 = vmax.f32 %v522_v27, %v544_v35  ;;  %v1609_v41 = vmax.f32 %v545_v36, %v567_v39 }
 0x236   : > { %v1611_v42 = vmax.f32 %v546_v38, %v568_v40 }
 0x238   : > { %v1054_v43 = vpack.i.bf16 %v1611_v42, %v1609_v41 }
 0x23a   : > { %1055 = vrot.lane.b32.xlu0 %v1054_v43, %s1247_s29  ;;  %1050 = vrot.lane.b32.xlu1 %v1054_v43, %s1248_s18 }
 0x23e   : > { %1065 = vrot.lane.b32.xlu0 %v1054_v43, %s1250_s19  ;;  %1060 = vrot.lane.b32.xlu1 %v1054_v43, %s1249_s15 }
 0x2ac   : > { %v1056_v44 = vpop.permute.xlu0 %1055  ;;  %v1051_v45 = vpop.permute.xlu1 %1050 }
 0x2ad   : > { %v1058_v48 = vunpack.i.h.bf16 %v1056_v44  ;;  %v1057_v53 = vunpack.i.l.bf16 %v1056_v44  ;;  %v1053_v54 = vunpack.i.h.bf16 %v1051_v45  ;;  %v1052_v57 = vunpack.i.l.bf16 %v1051_v45 }
 0x2af   : > { %v585_v60 = vsel %vm1907_vm9, %v1057_v53, %v1058_v48  ;;  %v586_v61 = vsel %vm1908_vm15, %v1058_v48, %v1057_v53  ;;  %v575_v62 = vsel %vm1909_vm3, %v1052_v57, %v1053_v54  ;;  %v576_v63 = vsel %vm1910_vm5, %v1053_v54, %v1052_v57 }
 0x2b0   : > { %v577_v1 = vsel %vm1460_vm10, %v575_v62, -inf  ;;  %v578_v2 = vsel %vm1464_vm11, %v576_v63, -inf  ;;  %v1066_v0 = vpop.permute.xlu0 %1065  ;;  %v1061_v3 = vpop.permute.xlu1 %1060  ;;  %v587_v10 = vsel %vm1451_vm7, %v586_v61, -inf  ;;  %v588_v33 = vsel %vm1455_vm8, %v585_v60, -inf }
 0x2b1   : > { %v579_v6 = vmax.f32 %v1609_v41, %v577_v1  ;;  %v580_v7 = vmax.f32 %v1611_v42, %v578_v2  ;;  %v1068_v8 = vunpack.i.h.bf16 %v1066_v0  ;;  %v1067_v9 = vunpack.i.l.bf16 %v1066_v0 }
 0x2b2   : > { %v1063_v34 = vunpack.i.h.bf16 %v1061_v3  ;;  %v1062_v13 = vunpack.i.l.bf16 %v1061_v3  ;;  %vm1911_vm9 = vcmp.lt.s32.totalorder %v1440_v37, 2  ;;  %vm1913_vm3 = vcmp.lt.s32.totalorder %v1440_v37, 126 }
 0x2b3   : > { %v589_v14 = vmax.f32 %v579_v6, %v587_v10  ;;  %v590_v15 = vmax.f32 %v580_v7, %v588_v33  ;;  %v605_v16 = vsel %vm1911_vm9, %v1067_v9, %v1068_v8  ;;  %vm1912_vm15 = vmmov %vm1911_vm9  ;;  %vm1915_vm9 = vcmp.lt.s32.totalorder %v1440_v37, 16 }
 0x2b4   : > { %v606_v17 = vsel %vm1912_vm15, %v1068_v8, %v1067_v9  ;;  %v595_v18 = vsel %vm1913_vm3, %v1062_v13, %v1063_v34  ;;  %vm1914_vm5 = vmmov %vm1913_vm3  ;;  %v608_v29 = vsel %vm1496_vm2, %v605_v16, -inf  ;;  %vm1917_vm3 = vcmp.lt.s32.totalorder %v1440_v37, 112 }
 0x2b5   : > { %v596_v19 = vsel %vm1914_vm5, %v1063_v34, %v1062_v13  ;;  %v597_v20 = vsel %vm1471_vm13, %v595_v18, -inf  ;;  %v607_v28 = vsel %vm1492_vm1, %v606_v17, -inf  ;;  %vm1916_vm15 = vmmov %vm1915_vm9  ;;  %vm1919_vm2 = vnez %v1892_v55 }
 0x2b6   : > { %v598_v21 = vsel %vm1475_vm14, %v596_v19, -inf  ;;  %v599_v26 = vmax.f32 %v589_v14, %v597_v20  ;;  %vm1918_vm5 = vmmov %vm1917_vm3  ;;  %vm1920_vm1 = vnez %v1894_v56 }
 0x2b7   : > { %v600_v27 = vmax.f32 %v590_v15, %v598_v21 }
 0x2b8   : > { %v609_v30 = vmax.f32 %v599_v26, %v607_v28 }
 0x2b9   : > { %v610_v31 = vmax.f32 %v600_v27, %v608_v29 }
 0x2bb   : > { %v1074_v32 = vpack.i.bf16 %v610_v31, %v609_v30 }
 0x2bd   : > { %1075 = vrot.lane.b32.xlu0 %v1074_v32, %s1251_s11  ;;  %1070 = vrot.lane.b32.xlu1 %v1074_v32, %s1252_s16 }
 0x2c1   : > { %1085 = vrot.lane.b32.xlu0 %v1074_v32, %s1253_s17  ;;  %1080 = vrot.lane.b32.xlu1 %v1074_v32, %s1254_s20 }
 0x32f   : > { %v1076_v35 = vpop.permute.xlu0 %1075  ;;  %v1071_v36 = vpop.permute.xlu1 %1070 }
 0x330   : > { %v1078_v38 = vunpack.i.h.bf16 %v1076_v35  ;;  %v1077_v39 = vunpack.i.l.bf16 %v1076_v35  ;;  %v1073_v40 = vunpack.i.h.bf16 %v1071_v36  ;;  %v1072_v43 = vunpack.i.l.bf16 %v1071_v36 }
 0x332   : > { %v625_v44 = vsel %vm1915_vm9, %v1077_v39, %v1078_v38  ;;  %v626_v45 = vsel %vm1916_vm15, %v1078_v38, %v1077_v39  ;;  %v615_v48 = vsel %vm1917_vm3, %v1072_v43, %v1073_v40  ;;  %v616_v53 = vsel %vm1918_vm5, %v1073_v40, %v1072_v43 }
 0x333   : > { %v617_v54 = vsel %vm1919_vm2, %v615_v48, -inf  ;;  %v618_v57 = vsel %vm1920_vm1, %v616_v53, -inf  ;;  %v1086_v60 = vpop.permute.xlu0 %1085  ;;  %v1081_v61 = vpop.permute.xlu1 %1080  ;;  %vm1921_vm9 = vnez %v1888_v51  ;;  %vm1922_vm15 = vnez %v1890_v52 }
 0x334   : > { %v619_v62 = vmax.f32 %v609_v30, %v617_v54  ;;  %v620_v63 = vmax.f32 %v610_v31, %v618_v57  ;;  %v1088_v1 = vunpack.i.h.bf16 %v1086_v60  ;;  %v1087_v2 = vunpack.i.l.bf16 %v1086_v60 }
 0x335   : > { %v627_v0 = vsel %vm1921_vm9, %v626_v45, -inf  ;;  %v628_v3 = vsel %vm1922_vm15, %v625_v44, -inf  ;;  %v1083_v6 = vunpack.i.h.bf16 %v1081_v61  ;;  %v1082_v7 = vunpack.i.l.bf16 %v1081_v61 }
 0x336   : > { %v629_v8 = vmax.f32 %v619_v62, %v627_v0  ;;  %v630_v9 = vmax.f32 %v620_v63, %v628_v3  ;;  %vm1923_vm3 = vcmp.lt.s32.totalorder %v1440_v37, 32  ;;  %vm1925_vm1 = vcmp.lt.s32.totalorder %v1440_v37, 96 }
 0x337   : > { %v645_v10 = vsel %vm1923_vm3, %v1087_v2, %v1088_v1  ;;  %vm1924_vm5 = vmmov %vm1923_vm3  ;;  %v635_v34 = vsel %vm1925_vm1, %v1082_v7, %v1083_v6  ;;  %vm1929_vm3 = vcmp.lt.s32.totalorder %v1440_v37, 127 }
 0x338   : > { %v646_v33 = vsel %vm1924_vm5, %v1088_v1, %v1087_v2  ;;  %vm1926_vm2 = vmmov %vm1925_vm1  ;;  %v637_v14 = vsel %vm1573_vm6, %v635_v34, -inf  ;;  %v648_v19 = vsel %vm1589_vm12, %v645_v10, -inf  ;;  %vm1927_vm1 = vcmp.lt.s32.totalorder %v1440_v37, 1 }
 0x339   : > { %v636_v13 = vsel %vm1926_vm2, %v1083_v6, %v1082_v7  ;;  %v639_v16 = vmax.f32 %v629_v8, %v637_v14  ;;  %v647_v18 = vsel %vm1585_vm4, %v646_v33, -inf  ;;  %vm1928_vm2 = vmmov %vm1927_vm1 }
 0x33a   : > { %v638_v15 = vsel %vm1577_vm0, %v636_v13, -inf  ;;  %vm1930_vm5 = vmmov %vm1929_vm3 }
 0x33b   : > { %v640_v17 = vmax.f32 %v630_v9, %v638_v15  ;;  %v1689_v20 = vmax.f32 %v639_v16, %v647_v18 }
 0x33d   : > { %v1691_v21 = vmax.f32 %v640_v17, %v648_v19 }
 0x33f   : > { %v1094_v26 = vpack.i.bf16 %v1691_v21, %v1689_v20 }
 0x341   : > { %1095 = vrot.lane.b32.xlu0 %v1094_v26, %s1247_s29  ;;  %1090 = vrot.lane.b32.xlu1 %v1094_v26, %s1248_s18  ;;  %s1183_s29 = scalar_lea.vmem %s1182_s23, 512 }
 0x345   : > { %1105 = vrot.lane.b32.xlu0 %v1094_v26, %s1250_s19  ;;  %1100 = vrot.lane.b32.xlu1 %v1094_v26, %s1249_s15  ;;  %s933_s19 = sshll.u32 %s1401_s8, 4 }
 0x346   : > { %s294_s9 = scalar_lea.vmem [#allocation5], %s933_s19 }
 0x3b3   : > { %v1096_v27 = vpop.permute.xlu0 %1095  ;;  %v1091_v28 = vpop.permute.xlu1 %1090 }
 0x3b4   : > { %v1098_v29 = vunpack.i.h.bf16 %v1096_v27  ;;  %v1097_v30 = vunpack.i.l.bf16 %v1096_v27  ;;  %v1093_v31 = vunpack.i.h.bf16 %v1091_v28  ;;  %v1092_v32 = vunpack.i.l.bf16 %v1091_v28 }
 0x3b6   : > { %v665_v35 = vsel %vm1927_vm1, %v1097_v30, %v1098_v29  ;;  %v666_v36 = vsel %vm1928_vm2, %v1098_v29, %v1097_v30  ;;  %v655_v38 = vsel %vm1929_vm3, %v1092_v32, %v1093_v31  ;;  %v656_v39 = vsel %vm1930_vm5, %v1093_v31, %v1092_v32 }
 0x3b7   : > { %v657_v40 = vsel %vm1460_vm10, %v655_v38, -inf  ;;  %v658_v43 = vsel %vm1464_vm11, %v656_v39, -inf  ;;  %v1106_v44 = vpop.permute.xlu0 %1105  ;;  %v1101_v45 = vpop.permute.xlu1 %1100  ;;  %v667_v60 = vsel %vm1451_vm7, %v666_v36, -inf  ;;  %v668_v61 = vsel %vm1455_vm8, %v665_v35, -inf }
 0x3b8   : > { %v659_v48 = vmax.f32 %v1689_v20, %v657_v40  ;;  %v660_v53 = vmax.f32 %v1691_v21, %v658_v43  ;;  %v1108_v54 = vunpack.i.h.bf16 %v1106_v44  ;;  %v1107_v57 = vunpack.i.l.bf16 %v1106_v44 }
 0x3b9   : > { %v1103_v62 = vunpack.i.h.bf16 %v1101_v45  ;;  %v1102_v49 = vunpack.i.l.bf16 %v1101_v45  ;;  %vm1931_vm10 = vcmp.lt.s32.totalorder %v1440_v37, 2  ;;  %vm1933_vm1 = vcmp.lt.s32.totalorder %v1440_v37, 126 }
 0x3ba   : > { %v669_v63 = vmax.f32 %v659_v48, %v667_v60  ;;  %v670_v1 = vmax.f32 %v660_v53, %v668_v61  ;;  %v685_v50 = vsel %vm1931_vm10, %v1107_v57, %v1108_v54  ;;  %vm1932_vm11 = vmmov %vm1931_vm10  ;;  %vm1935_vm7 = vnez %v1884_v4 }
 0x3bb   : > { %v686_v2 = vsel %vm1932_vm11, %v1108_v54, %v1107_v57  ;;  %v675_v0 = vsel %vm1933_vm1, %v1102_v49, %v1103_v62  ;;  %vm1934_vm2 = vmmov %vm1933_vm1  ;;  %vm1936_vm8 = vnez %v1886_v5  ;;  %vm1939_vm3 = vcmp.lt.s32.totalorder %v1440_v37, 112 }
 0x3bc   : > { %v676_v46 = vsel %vm1934_vm2, %v1103_v62, %v1102_v49  ;;  %v677_v47 = vsel %vm1471_vm13, %v675_v0, -inf  ;;  %v687_v8 = vsel %vm1935_vm7, %v686_v2, -inf  ;;  %v688_v9 = vsel %vm1936_vm8, %v685_v50, -inf  ;;  %vm1940_vm5 = vmmov %vm1939_vm3 }
 0x3bd   : > { %v678_v3 = vsel %vm1475_vm14, %v676_v46, -inf  ;;  %v679_v6 = vmax.f32 %v669_v63, %v677_v47  ;;  %vm1937_vm13 = vcmp.lt.s32.totalorder %v1440_v37, 16  ;;  %vm1941_vm10 = vnez %v1892_v55 }
 0x3be   : > { %v680_v7 = vmax.f32 %v670_v1, %v678_v3  ;;  %vm1938_vm14 = vmmov %vm1937_vm13  ;;  %vm1942_vm11 = vnez %v1894_v56  ;;  %v734_v56 = vpack.c.bf16 %v1611_v42, %v1611_v42  ;;  %v733_v44 = vpack.c.bf16 %v1609_v41, %v1609_v41 }
 0x3bf   : > { %v689_v10 = vmax.f32 %v679_v6, %v687_v8  ;;  %vm1943_vm1 = vcmp.lt.s32.totalorder %v1440_v37, 32  ;;  %v736_v41 = vpack.c.bf16 %v1691_v21, %v1691_v21  ;;  %v735_v54 = vpack.c.bf16 %v1689_v20, %v1689_v20 }
 0x3c0   : > { %v690_v33 = vmax.f32 %v680_v7, %v688_v9  ;;  %vm1944_vm2 = vmmov %vm1943_vm1  ;;  %v742_v62 = vrot.slane %v734_v56, 7  ;;  %v741_v12 = vrot.slane %v733_v44, 7  ;;  %v732_v63 = vpack.c.bf16 %v1423_v24, %v1423_v24 }
 0x3c1   : > { %v746_v21 = vrot.slane %v736_v41, 6  ;;  %v745_v1 = vrot.slane %v735_v54, 6  ;;  %v731_v20 = vpack.c.bf16 %v1421_v23, %v1421_v23  ;;  %v767_v23 = vld [vmem:[%s1843_s5] sm:$0xf]  ;;  %vm774_vm8 = vcmask 64512  }
 0x3c2   : > { %v1114_v34 = vpack.i.bf16 %v690_v33, %v689_v10 }
 0x3c4   : > { %1115 = vrot.lane.b32.xlu0 %v1114_v34, %s1251_s11  ;;  %1110 = vrot.lane.b32.xlu1 %v1114_v34, %s1252_s16  ;;  %s855_s11 = sshll.u32 %s294_s9, 4  ;;  %s1796_s11 = int_to_ptr.vmem [resolvable:$true] %s855_s11 }
 0x3c5   : > { %s1177_s28 = scalar_lea.vmem %s1796_s11, 256  ;;  %p1184_p7 = scmp.lt.s32.totalorder %s1796_s11, %s1182_s23 }
 0x3c6   : > { %p1178_p6 = scmp.ne.s32.totalorder %s1796_s11, %s1177_s28  ;;  %p1185_p10 = scmp.lt.s32.totalorder %s1183_s29, %s1177_s28 }
 0x3c8   : > { %1125 = vrot.lane.b32.xlu0 %v1114_v34, %s1253_s17  ;;  %1120 = vrot.lane.b32.xlu1 %v1114_v34, %s1254_s20  ;;  %s1794_s20 = scalar_lea.hbm %s1845_s7, %s952_s21  ;;  %p1179_p12 = pnand %p1178_p6, %p1949_p11 }
 0x3c9   : > { %p1186_p2 = por %p1185_p10, %p1184_p7 }
 0x3ca   : > { %p1180_p13 = pneg %p1179_p12 }
 0x3cc   : > { %771 = vperm.xlu1 %1129, %v768_v58   ;;  %p1187_p4 = pnand %p1186_p2, %p1180_p13 }
 0x436   : > { %v1116_v59 = vpop.permute.xlu0 %1115  ;;  %v1111_v4 = vpop.permute.xlu1 %1110 }
 0x437   : > { %v1118_v5 = vunpack.i.h.bf16 %v1116_v59  ;;  %v1117_v13 = vunpack.i.l.bf16 %v1116_v59  ;;  %v1113_v14 = vunpack.i.h.bf16 %v1111_v4  ;;  %v1112_v15 = vunpack.i.l.bf16 %v1111_v4 }
 0x439   : > { %v705_v16 = vsel %vm1937_vm13, %v1117_v13, %v1118_v5  ;;  %v706_v17 = vsel %vm1938_vm14, %v1118_v5, %v1117_v13  ;;  %v695_v18 = vsel %vm1939_vm3, %v1112_v15, %v1113_v14  ;;  %v696_v19 = vsel %vm1940_vm5, %v1113_v14, %v1112_v15 }
 0x43a   : > { %v697_v26 = vsel %vm1941_vm10, %v695_v18, -inf  ;;  %v698_v27 = vsel %vm1942_vm11, %v696_v19, -inf  ;;  %v1126_v28 = vpop.permute.xlu0 %1125  ;;  %v1121_v29 = vpop.permute.xlu1 %1120  ;;  %v707_v36 = vsel %vm1921_vm9, %v706_v17, -inf  ;;  %v708_v38 = vsel %vm1922_vm15, %v705_v16, -inf }
 0x43b   : > { %v699_v30 = vmax.f32 %v689_v10, %v697_v26  ;;  %v700_v31 = vmax.f32 %v690_v33, %v698_v27  ;;  %v1128_v32 = vunpack.i.h.bf16 %v1126_v28  ;;  %v1127_v35 = vunpack.i.l.bf16 %v1126_v28 }
 0x43c   : > { %v1123_v39 = vunpack.i.h.bf16 %v1121_v29  ;;  %v1122_v40 = vunpack.i.l.bf16 %v1121_v29  ;;  %vm1945_vm9 = vcmp.lt.s32.totalorder %v1440_v37, 96 }
 0x43d   : > { %v709_v43 = vmax.f32 %v699_v30, %v707_v36  ;;  %v710_v55 = vmax.f32 %v700_v31, %v708_v38  ;;  %v725_v45 = vsel %vm1943_vm1, %v1127_v35, %v1128_v32  ;;  %v726_v51 = vsel %vm1944_vm2, %v1128_v32, %v1127_v35  ;;  %vm1946_vm15 = vmmov %vm1945_vm9 }
 0x43e   : > { %v715_v52 = vsel %vm1945_vm9, %v1122_v40, %v1123_v39  ;;  %v716_v48 = vsel %vm1946_vm15, %v1123_v39, %v1122_v40  ;;  %v727_v61 = vsel %vm1585_vm4, %v726_v51, -inf  ;;  %v728_v37 = vsel %vm1589_vm12, %v725_v45, -inf }
 0x43f   : > { %v717_v53 = vsel %vm1573_vm6, %v715_v52, -inf  ;;  %v718_v42 = vsel %vm1577_vm0, %v716_v48, -inf  ;;  %vm751_vm6 = vcmask 1040384   ;;  %vm762_vm4 = vcmask 1042432  }
 0x440   : > { %v719_v57 = vmax.f32 %v709_v43, %v717_v53  ;;  %v720_v60 = vmax.f32 %v710_v55, %v718_v42  ;;  %v757_v22 = vsel %vm751_vm6, %v732_v63, %v742_v62  ;;  %vm778_vm0 = vcmask 1043456  }
 0x441   : > { %v754_v46 = vsel %vm751_vm6, %v731_v20, %v741_v12  ;;  %vm1947_vm12 = vcmask 1041408  }
 0x442   : > { %v730_v11 = vmax.f32 %v720_v60, %v728_v37  ;;  %v729_v49 = vmax.f32 %v719_v57, %v727_v61  ;;  %v761_v47 = vsel %vm1947_vm12, %v757_v22, %v746_v21  ;;  %vm1948_vm7 = vmmov %vm1947_vm12 }
 0x443   : > { %v759_v3 = vsel %vm1948_vm7, %v754_v46, %v745_v1 }
 0x444   : > { %v738_v50 = vpack.c.bf16 %v730_v11, %v730_v11  ;;  %v737_v2 = vpack.c.bf16 %v729_v49, %v729_v49 }
 0x446   : > { %v750_v0 = vrot.slane %v738_v50, 5  ;;  %v749_v25 = vrot.slane %v737_v2, 5 }
 0x448   : > { %v766_v6 = vsel %vm762_vm4, %v761_v47, %v750_v0  ;;  %v764_v7 = vsel %vm762_vm4, %v759_v3, %v749_v25 }
 0x449   : > { %942 = vmatprep.subr.msk.bf16.mxu1 %vm778_vm0, %v766_v6  ;;  %v779_v24 = vsel %vm778_vm0, %v764_v7, 0 }
 0x44a   : > { %784 = vmatpush1.bf16.msra.mxu1 %v779_v24 }
 0x44b   : > { %v772_v8 = vpop.permute.xlu1 %771 }
 0x44d   : > { %943 = vmatmul.mubr.msk.bf16.vlgmr.msra.gmra.mrb[0].mxu1 %vm774_vm8, %v767_v23 }
 0x520   : > { %v817_v9 = vpop.f32.mrb[0].mxu1 }
 0x521   : > { %v818_v10 = vadd.f32 %v817_v9, %v772_v8  ;;  %v819_v33 = vpop.f32.mrb[1].mxu1 }
 0x522   : > { %v820_v34 = vadd.f32 %v819_v33, %v772_v8  ;;  %v821_v58 = vpop.f32.mrb[2].mxu1 }
 0x523   : > { %v944_v59 = vmul.f32 -1.442695, %v818_v10  ;;  %v822_v4 = vpop.f32.mrb[3].mxu1 }
 0x524   : > { %v945_v5 = vmul.f32 -1.442695, %v820_v34 }
 0x525   : > { %1139 = vpow2.f32 %v944_v59 }
 0x526   : > { %1141 = vpow2.f32 %v945_v5 }
 0x52f   : > { %v1140_v13 = vpop.eup %1139 }
 0x530   : > { %v1142_v14 = vpop.eup %1141  ;;  %v830_v15 = vadd.f32 1.0, %v1140_v13 }
 0x531   : > { %v831_v16 = vadd.f32 1.0, %v1142_v14 }
 0x532   : > { %1143 = vrcp.f32 %v830_v15 }
 0x533   : > { %1145 = vrcp.f32 %v831_v16 }
 0x53c   : > { %v1144_v17 = vpop.eup %1143 }
 0x53d   : > { %v1146_v18 = vpop.eup %1145  ;;  %v836_v19 = vmul.f32 %v1144_v17, %v818_v10 }
 0x53e   : > { %v837_v26 = vmul.f32 %v1146_v18, %v820_v34 }
 0x53f   : > { %838 = vst [vmem:[%s294_s9] sm:$0xff] %v836_v19 }
 0x540   : > { %839 = vst [vmem:[%s294_s9 + $0x8] sm:$0xff] %v837_v26 }
 0x541   : > { %1190 = shalt.err (!%p1187_p4)
}
 0x542   : > { %s1191_s8 = scalar_lea.hbm %s1794_s20, 256  ;;  %s1195_s19 = scalar_lea.hbm %s1845_s7, 512 }
 0x543   : > { %p1192_p5 = scmp.ne.s32.totalorder %s1794_s20, %s1191_s8  ;;  %p1196_p0 = scmp.lt.u32.totalorder %s1794_s20, %s1845_s7 }
 0x544   : > { %p1197_p1 = scmp.lt.u32.totalorder %s1195_s19, %s1191_s8  ;;  %p1199_p6 = scmp.lt.u32.totalorder %s1191_s8, %s1794_s20 }
 0x545   : > { %p1193_p8 = pnand %p1192_p5, %p1949_p11 }
 0x546   : > { %p1198_p3 = por %p1197_p1, %p1196_p0 }
 0x547   : > { %p1194_p9 = pneg %p1193_p8 }
 0x548   : > { %p1200_p12 = por %p1199_p6, %p1198_p3 }
 0x54a   : > { %p1201_p13 = pnand %p1200_p12, %p1194_p9 }
 0x54c   : > { %1204 = shalt.err (!%p1201_p13)
}
 0x54d   : > { %955 = dma.vmem_to_hbm [thread:$0]  (%p1949_p11), %s1796_s11, 256, %s1794_s20, %s841_s22  }
 0x54e PF: > { %s867_s16 = sand.u32 1, %s1231_s24   ;;  %p1950_p7 = scmp.ne.s32.totalorder %s1867_s14, 0 }
 0x54f   : > { %p1951_p10 = scmp.ge.s32.totalorder %s1243_s27, 2  ;;  %s868_s17 = scalar_lea.sflag [#allocation4], %s867_s16 }
 0x551   : > { %p962_p2 = pnand %p1951_p10, %p1950_p7 }
 0x553   : > { %1226 = dma.done.wait (!%p962_p2), %s868_s17, 256  }
 0x554   : > { %1228 = vsyncadd (!%p962_p2), %s868_s17, 4294967040  ;;  %p20_p4 = scmp.ge.s32.totalorder %s1321_s30, 4   ;;  %s1952_s24 = smov %s1235_s25 }
 0x555   : > { %s1953_s25 = smov %s1239_s26  ;;  %s1954_s26 = smov %s1333_s10 }
 0x556   : > { %s1955_s27 = smov %s1321_s30  ;;  %22 = sbr.rel (!%p20_p4) target bundleno = 5 (0x5), region = 93 }
 0x55d   :  { %873 = vsyncpa [#allocation3], 1 }
 0x55e   :  { %875 = vsyncpa [#allocation3 + $0x1], 1 }
 0x55f   :  { %876 = vsyncpa [#allocation4], 1 }
 0x560   :  { %878 = vsyncpa [#allocation4 + $0x1], 1 }

</bundles_post_ra>
